<compile_context>
chip_gen: v7x
topology: tpu7x:2x2x1
jax: 0.10.0
libtpu: 0.0.40
codegen_flags: <defaults>
</compile_context>

<pallas_src>
import jax
import jax.numpy as jnp
from jax.experimental import pallas as pl
from jax.experimental.pallas import tpu as pltpu


def _bbox_head_kernel(w_ref, x_ref, b_ref, o_ref):
    # w_ref: (O, C)     resident weight block
    # x_ref: (C, t_hw)  one spatial tile of one image (native NCHW, no transpose)
    # b_ref: (O, 1)     resident bias block
    # o_ref: (O, t_hw)  lane-dense output tile (t_hw is a multiple of 128)
    acc = jnp.dot(w_ref[...], x_ref[...], preferred_element_type=jnp.float32)
    o_ref[...] = (acc + b_ref[...]).astype(o_ref.dtype)


def bbox_head_forward(x_nchw, weight, bias, *, num_anchors=2, t_hw=2048):
    """1x1-conv bbox head computed in native NCHW layout.

    x_nchw: (N, C, H, W); weight: (A*4, C); bias: (A*4,)
    Returns (N, H*W*A, 4) == conv1x1 -> permute(0,2,3,1) -> view(N, -1, 4).
    """
    N, C, H, W = x_nchw.shape
    O = weight.shape[0]
    assert O == num_anchors * 4
    HW = H * W

    LANE = 128
    itemsize = jnp.dtype(x_nchw.dtype).itemsize

    if HW >= LANE:
        # Largest multiple of 128 that fits in HW (block never exceeds array).
        floor_hw = (HW // LANE) * LANE
        # Double-buffered x tile must fit the scoped VMEM budget (conservative
        # 8 MiB works on v5e/v6e/v7x defaults; raise t_hw / vmem_limit_bytes
        # explicitly on v6e if desired).
        vmem_budget = 8 * 1024 * 1024
        max_thw = max(LANE, (vmem_budget // (2 * C * itemsize) // LANE) * LANE)
        t_hw = max(LANE, min((max(t_hw, LANE) // LANE) * LANE, floor_hw, max_thw))
        # v7x has 2 TensorCores: make sure there are >= 2 grid steps to shard.
        while N * pl.cdiv(HW, t_hw) < 2 and t_hw >= 2 * LANE:
            t_hw = max(LANE, (t_hw // 2 // LANE) * LANE)
    else:
        # Tiny spatial extent: block == full dim (legal layout).
        t_hw = HW

    grid = (N, pl.cdiv(HW, t_hw))

    # (N, C, H, W) -> (N, C, H*W) is a pure view; no HBM relayout of the input.
    x3d = x_nchw.reshape(N, C, HW)
    b2d = bias.reshape(O, 1)

    cost = pl.CostEstimate(
        flops=2 * N * HW * C * O,
        transcendentals=0,
        bytes_accessed=itemsize * (N * HW * C + C * O + O + N * HW * O),
    )

    out3d = pl.pallas_call(
        _bbox_head_kernel,
        out_shape=jax.ShapeDtypeStruct((N, O, HW), x_nchw.dtype),
        grid=grid,
        in_specs=[
            pl.BlockSpec((O, C), lambda n, j: (0, 0)),              # weight: resident
            pl.BlockSpec((None, C, t_hw), lambda n, j: (n, 0, j)),  # x tile (batch squeezed)
            pl.BlockSpec((O, 1), lambda n, j: (0, 0)),              # bias: resident
        ],
        out_specs=pl.BlockSpec((None, O, t_hw), lambda n, j: (n, 0, j)),
        compiler_params=pltpu.CompilerParams(
            dimension_semantics=("parallel", "parallel")),
        cost_estimate=cost,
    )(weight, x3d, b2d)

    # Small output-side relayout (O/C of the input traffic):
    # (N, O, HW) -> (N, HW, O) -> (N, HW*A, 4)  == permute(0,2,3,1).view(N,-1,4)
    out = jnp.transpose(out3d, (0, 2, 1))
    return out.reshape(N, HW * num_anchors, 4)


def _reference(x, weight, bias, num_anchors):
    N, C, H, W = x.shape
    ref = jnp.einsum("nchw,oc->nhwo", x, weight) + bias
    return ref.reshape(N, H * W * num_anchors, 4)


if __name__ == "__main__":
    key = jax.random.PRNGKey(0)
    num_anchors = 2
    O = num_anchors * 4

    # Test 1: divisible spatial extent (16x16 -> HW=256), batch=2, inchannels=32.
    k_x, k_w, k_b, k_x2 = jax.random.split(key, 4)
    N, C, H, W = 2, 32, 16, 16
    x = jax.random.normal(k_x, (N, C, H, W), dtype=jnp.float32)
    weight = jax.random.normal(k_w, (O, C), dtype=jnp.float32) * 0.05
    bias = jax.random.normal(k_b, (O,), dtype=jnp.float32) * 0.05

    out = jax.block_until_ready(bbox_head_forward(x, weight, bias,
                                                  num_anchors=num_anchors))
    ref = _reference(x, weight, bias, num_anchors)
    assert out.shape == (N, H * W * num_anchors, 4)
    assert jnp.allclose(out, ref, atol=1e-4, rtol=1e-4)

    # Test 2: ragged last tile (20x20 -> HW=400, t_hw=256 -> tiles 256 + 144),
    # exercising the no-padding / masked-tail path.
    H2, W2 = 20, 20
    x2 = jax.random.normal(k_x2, (N, C, H2, W2), dtype=jnp.float32)
    out2 = jax.block_until_ready(bbox_head_forward(x2, weight, bias,
                                                   num_anchors=num_anchors,
                                                   t_hw=256))
    ref2 = _reference(x2, weight, bias, num_anchors)
    assert out2.shape == (N, H2 * W2 * num_anchors, 4)
    assert jnp.allclose(out2, ref2, atol=1e-4, rtol=1e-4)

    print("KERNEL_OK")
</pallas_src>

<mosaic_0001>
module attributes {stable_mosaic.version = 11 : i64} {
  func.func @_bbox_head_kernel(%arg0: i32, %arg1: i32, %arg2: memref<8x32xf32, #tpu.memory_space<vmem>>, %arg3: memref<1x32x256xf32, #tpu.memory_space<vmem>>, %arg4: memref<8x1xf32, #tpu.memory_space<vmem>>, %arg5: memref<1x8x256xf32, #tpu.memory_space<vmem>>) attributes {dimension_semantics = [#tpu.dimension_semantics<parallel>, #tpu.dimension_semantics<parallel>], iteration_bounds = array<i64: 2, 1>, scalar_prefetch = 0 : i64, scratch_operands = 0 : i64, tpu.core_type = #tpu.core_type<tc>, window_params = [{pipeline_mode = #tpu.pipeline_mode<synchronous>, transform_indices = @transform_0, window_bounds = array<i64: 8, 32>}, {transform_indices = @transform_1, window_bounds = array<i64: 1, 32, 256>}, {pipeline_mode = #tpu.pipeline_mode<synchronous>, transform_indices = @transform_2, window_bounds = array<i64: 8, 1>}, {transform_indices = @transform_3, window_bounds = array<i64: 1, 8, 256>}]} {
    %c0 = arith.constant 0 : index
    %c0_0 = arith.constant 0 : index
    %0 = vector.load %arg2[%c0, %c0_0] : memref<8x32xf32, #tpu.memory_space<vmem>>, vector<8x32xf32>
    %c0_1 = arith.constant 0 : index
    %c0_2 = arith.constant 0 : index
    %c0_3 = arith.constant 0 : index
    %1 = vector.load %arg3[%c0_1, %c0_2, %c0_3] : memref<1x32x256xf32, #tpu.memory_space<vmem>>, vector<1x32x256xf32>
    %2 = vector.shape_cast %1 : vector<1x32x256xf32> to vector<32x256xf32>
    %cst = arith.constant dense<0.000000e+00> : vector<8x256xf32>
    %3 = tpu.matmul %0, %2, %cst {dimension_numbers = #tpu.dot_dimension_numbers<[1], [0], [0], [1], [0, 0, 1, 1], [], []>} : vector<8x32xf32>, vector<32x256xf32>, vector<8x256xf32> -> vector<8x256xf32>
    %c0_4 = arith.constant 0 : index
    %c0_5 = arith.constant 0 : index
    %4 = vector.load %arg4[%c0_4, %c0_5] : memref<8x1xf32, #tpu.memory_space<vmem>>, vector<8x1xf32>
    %5 = vector.broadcast %4 : vector<8x1xf32> to vector<8x256xf32>
    %6 = arith.addf %3, %5 : vector<8x256xf32>
    %c0_6 = arith.constant 0 : index
    %c0_7 = arith.constant 0 : index
    %c0_8 = arith.constant 0 : index
    %7 = vector.load %arg5[%c0_6, %c0_7, %c0_8] : memref<1x8x256xf32, #tpu.memory_space<vmem>>, vector<1x8x256xf32>
    %8 = vector.shape_cast %7 : vector<1x8x256xf32> to vector<8x256xf32>
    %9 = vector.shape_cast %6 : vector<8x256xf32> to vector<1x8x256xf32>
    tpu.vector_store %arg5[%c0_6, %c0_7, %c0_8], %9 {strides = array<i32>} : memref<1x8x256xf32, #tpu.memory_space<vmem>>, vector<1x8x256xf32>,
    return
  }
  func.func @transform_0(%arg0: i32, %arg1: i32) -> (i32, i32) {
    %c0_i32 = arith.constant 0 : i32
    %c0_i32_0 = arith.constant 0 : i32
    %c0_i32_1 = arith.constant 0 : i32
    return %c0_i32, %c0_i32_0 : i32, i32
  }
  func.func @transform_1(%arg0: i32, %arg1: i32) -> (i32, i32, i32) {
    %c0_i32 = arith.constant 0 : i32
    %c0_i32_0 = arith.constant 0 : i32
    return %arg0, %c0_i32, %arg1 : i32, i32, i32
  }
  func.func @transform_2(%arg0: i32, %arg1: i32) -> (i32, i32) {
    %c0_i32 = arith.constant 0 : i32
    %c0_i32_0 = arith.constant 0 : i32
    %c0_i32_1 = arith.constant 0 : i32
    return %c0_i32, %c0_i32_0 : i32, i32
  }
  func.func @transform_3(%arg0: i32, %arg1: i32) -> (i32, i32, i32) {
    %c0_i32 = arith.constant 0 : i32
    %c0_i32_0 = arith.constant 0 : i32
    return %arg0, %c0_i32, %arg1 : i32, i32, i32
  }
}

</mosaic_0001>

<bundles_post_ra>
// kernel: tpu_custom_call.1
= control target key start
LH: loop header
LB: loop body
LE: loop exit
PB: predicated region body
PF: predicated region fallthrough
CT: control target
= control target key end

     0   :  { %8 = vsyncpa [#allocation3], 0  ;;  %s815_s0 = inlined_call_operand.vmem [shape: f32[8,32], index: 0, kind: input, shape index: {}]   ;;  %s816_s1 = inlined_call_operand.hbm [shape: f32[2,32,256], index: 1, kind: input, shape index: {}]   ;;  %s817_s2 = inlined_call_operand.vmem [shape: f32[8,1], index: 2, kind: input, shape index: {}]   ;;  %s818_s3 = inlined_call_operand.hbm [shape: f32[2,8,256], index: 3, kind: output, shape index: {}]  }
   0x1   :  { %10 = vsyncpa [#allocation3 + $0x1], 0 }
   0x2   :  { %11 = vsyncpa [#allocation4], 0 }
   0x3   :  { %13 = vsyncpa [#allocation4 + $0x1], 0  ;;  %s635_s12 = smov 0   ;;  %s637_s13 = smov 0  }
   0x4   :  { %s639_s14 = smov 0   ;;  %s641_s15 = smov 0  }
   0x5   :  { %s643_s16 = smov 0   ;;  %s645_s17 = smov 0  }
   0x6 LB: > { %s402_s18 = sadd.s32 4294967295, %s607_s17   ;;  %s403_s19 = sadd.s32 4294967294, %s607_s17   ;;  %s607_s17 = sphi %s645_s17, %s19_s17   ;;  %s603_s16 = sphi %s643_s16, %s833_s16   ;;  %s599_s15 = sphi %s641_s15, %s832_s15   ;;  %s595_s14 = sphi %s639_s14, %s831_s14   ;;  %s591_s13 = sphi %s637_s13, %s830_s13   ;;  %s587_s12 = sphi %s635_s12, %s829_s12  }
   0x7   : > { %s31_s20 = sadd.s32 1, %s603_s16  ;;  %s61_s21 = sadd.s32 1, %s595_s14 }
   0x8   : > { %p33_p0 = scmp.ge.s32.totalorder %s31_s20, 2  ;;  %p68_p1 = scmp.ne.s32.totalorder %s595_s14, %s591_s13 }
   0x9   : > { %p69_p2 = scmp.eq.s32.totalorder %s607_s17, 0  ;;  %p74_p3 = scmp.ne.s32.totalorder %s591_s13, %s587_s12 }
   0xa   : > { %s835_s20 = smov (%p33_p0, %s31_s20), 0  ;;  %p75_p5 = scmp.eq.s32.totalorder %s402_s18, 0 }
   0xb   : > { %p676_p4 = por %p69_p2, %p68_p1  ;;  %s56_s23 = ssub.s32 %s603_s16, %s835_s20 }
   0xc   : > { %p121_p6 = scmp.eq.s32.totalorder %s402_s18, 1  ;;  %p59_p7 = scmp.eq.s32.totalorder %s56_s23, 0 }
   0xd   : > { %p682_p8 = por %p75_p5, %p74_p3  ;;  %p127_p10 = scmp.eq.s32.totalorder %s403_s19, 1 }
   0xe   : > { %p686_p9 = por %p121_p6, %p68_p1  ;;  %p440_p13 = scmp.lt.s32.totalorder %s607_s17, 2 }
   0xf   : > { %s691_s26 = scalar_select %p59_p7, %s595_s14, %s61_s21  }
  0x10   : > { %s822_s25 = scalar_select %p686_p9, 1, 0 }
  0x11   : > { %p693_p11 = por %p127_p10, %p74_p3  ;;  %s153_s28 = sand.u32 1, %s595_s14  }
  0x12   : > { %s406_s29 = sshll.u32 %s153_s28, 6  ;;  %s418_s30 = sshll.u32 %s603_s16, 10 }
  0x13   : > { %s823_s27 = scalar_select %p693_p11, 1, 0 }
  0x14   : > { %s704_s6 = scalar_lea.hbm %s816_s1, %s418_s30  ;;  %s157_s7 = scalar_lea.vmem [#allocation2], %s406_s29 }
  0x15   : > { %s166_s8 = sshll.u32 %s157_s7, 4  ;;  %p710_p0 = pnand %p440_p13, %p676_p4  ;;  %s706_s8 = int_to_ptr.vmem [resolvable:$true] %s166_s8 }
  0x16   : > { %s715_s10 = scalar_lea.sflag [#allocation3], %s153_s28  ;;  %s495_s11 = scalar_lea.hbm %s704_s6, 1024 }
  0x17   : > { %p496_p2 = scmp.ne.s32.totalorder %s704_s6, %s495_s11  ;;  %p497_p3 = pneg %p710_p0 }
  0x18   : > { %s500_s21 = scalar_lea.hbm %s816_s1, 2048  ;;  %p501_p4 = scmp.lt.u32.totalorder %s704_s6, %s816_s1 }
  0x19   : > { %p498_p5 = pnand %p497_p3, %p496_p2  ;;  %p502_p7 = scmp.lt.u32.totalorder %s500_s21, %s495_s11 }
  0x1a   : > { %p504_p13 = scmp.lt.u32.totalorder %s495_s11, %s704_s6 }
  0x1b   : > { %p499_p6 = pneg %p498_p5  ;;  %p503_p10 = por %p502_p7, %p501_p4 }
  0x1d   : > { %p505_p12 = por %p504_p13, %p503_p10 }
  0x1f   : > { %p506_p1 = pnand %p505_p12, %p499_p6 }
  0x21   : > { %509 = shalt.err (!%p506_p1)
}
  0x22   : > { %s510_s28 = scalar_lea.vmem %s706_s8, 1024  ;;  %s609_s29 = smov [#allocation2]  }
  0x23   : > { %p511_p2 = scmp.ne.s32.totalorder %s706_s8, %s510_s28  ;;  %s515_s30 = sshll.u32 %s609_s29, 4  ;;  %s516_s30 = int_to_ptr.vmem [resolvable:$false] %s515_s30 }
  0x24   : > { %s517_s4 = scalar_lea.vmem %s516_s30, 2048  ;;  %p518_p9 = scmp.lt.s32.totalorder %s706_s8, %s516_s30 }
  0x25   : > { %p513_p5 = pnand %p511_p2, %p497_p3  ;;  %p519_p4 = scmp.lt.s32.totalorder %s517_s4, %s510_s28 }
  0x27   : > { %p514_p11 = pneg %p513_p5  ;;  %p520_p7 = por %p519_p4, %p518_p9 }
  0x29   : > { %p521_p10 = pnand %p520_p7, %p514_p11 }
  0x2b   : > { %524 = shalt.err (!%p521_p10)
}
  0x2c   : > { %s610_s5 = smov 256   ;;  %s611_s7 = smov 16  }
  0x2d   : > { %435 = dma.hbm_to_vmem [thread:$0]  (!%p710_p0), %s704_s6, 1024, %s706_s8, %s715_s10, %s610_s5, %s610_s5, %s611_s7  }
  0x2e   : > { %p174_p12 = scmp.lt.s32.totalorder %s607_s17, 3  ;;  %p825_p1 = scmp.ge.s32.totalorder %s607_s17, 1 }
  0x30   : > { %p175_p3 = pnand %p825_p1, %p174_p12 }
  0x31   : > { %s747_s11 = sand.u32 (!%p175_p3), 1, %s591_s13  }
  0x32   : > { %178 = sbr.rel (%p175_p3) target bundleno = 298 (0x12a), region = 32  ;;  %s410_s18 = sshll.u32 (!%p175_p3), %s747_s11, 6 }
  0x33   : > { %s181_s19 = scalar_lea.sflag (!%p175_p3), [#allocation3], %s747_s11  ;;  %s184_s21 = scalar_lea.vmem (!%p175_p3), [#allocation2], %s410_s18 }
  0x39   : > { %578 = dma.done.wait (%p682_p8), %s181_s19, 1024  }
  0x3a   : > { %580 = vsyncadd (%p682_p8), %s181_s19, 4294966272  ;;  %v612_v0 = vmov 0.0   ;;  %v613_v1 = vmov 0   ;;  %v211_v2 = vld [vmem:[%s184_s21 + $0x8] sm:$0xff]  ;;  %v213_v3 = vld [vmem:[%s184_s21 + $0x18] sm:$0xff]  ;;  %vm224_vm0 = vcmask 261120  }
  0x3b   : > { %292 = vmatprep.mubr.f32.mxu0 %v612_v0  ;;  %494 = vset.pattern.permute.xlu0 %v613_v1  ;;  %v210_v4 = vld [vmem:[%s184_s21] sm:$0xff]  ;;  %v420_v5 = vpack.c.bf16 %v213_v3, %v211_v2  ;;  %v212_v6 = vld [vmem:[%s184_s21 + $0x10] sm:$0xff]  ;;  %v215_v7 = vld [vmem:[%s184_s21 + $0x28] sm:$0xff]  ;;  %s411_s10 = sshll.u32 %s747_s11, 4  ;;  %s419_s22 = sshll.u32 %s599_s15, 8 }
  0x3c   : > { %v217_v8 = vld [vmem:[%s184_s21 + $0x38] sm:$0xff]  ;;  %v422_v9 = vpack.c.bf16 %v212_v6, %v210_v4  ;;  %v214_v11 = vld [vmem:[%s184_s21 + $0x20] sm:$0xff]  ;;  %v216_v12 = vld [vmem:[%s184_s21 + $0x30] sm:$0xff]  ;;  %s206_s23 = scalar_lea.vmem [#allocation5], %s411_s10  ;;  %s766_s4 = scalar_lea.hbm %s818_s3, %s419_s22 }
  0x3d   : > { %v424_v10 = vpack.c.bf16 %v217_v8, %v215_v7  ;;  %421 = vmatprep.subr.bf16.mxu0 %v420_v5  ;;  %v218_v13 = vld [vmem:[%s817_s2] sm:$0xff]  ;;  %v426_v14 = vpack.c.bf16 %v216_v12, %v214_v11  ;;  %s318_s28 = sshll.u32 %s206_s23, 4  ;;  %s302_s5 = scalar_lea.sflag [#allocation4], %s747_s11  ;;  %s768_s28 = int_to_ptr.vmem [resolvable:$true] %s318_s28 }
  0x3e   : > { %423 = vmatpush1.bf16.msra.mxu0 %v422_v9  ;;  %221 = vperm.xlu0 %494, %v218_v13   ;;  %v209_v15 = vld [vmem:[%s815_s0] sm:$0xff]  ;;  %s525_s15 = scalar_lea.vmem %s768_s28, 256  ;;  %p826_p9 = scmp.ne.s32.totalorder %s822_s25, 0 }
  0x3f   : > { %425 = vmatprep.subr.bf16.mxu0 %v424_v10  ;;  %p526_p8 = scmp.ne.s32.totalorder %s768_s28, %s525_s15  ;;  %s614_s7 = smov [#allocation5]  }
  0x40   : > { %s529_s18 = sshll.u32 %s614_s7, 4  ;;  %s530_s18 = int_to_ptr.vmem [resolvable:$false] %s529_s18 }
  0x41   : > { %p527_p11 = pnand %p526_p8, %p826_p9  ;;  %s531_s19 = scalar_lea.vmem %s530_s18, 512 }
  0x42   : > { %427 = vmatpush1.bf16.msra.mxu0 %v426_v14  ;;  %p532_p6 = scmp.lt.s32.totalorder %s768_s28, %s530_s18  ;;  %p533_p13 = scmp.lt.s32.totalorder %s531_s19, %s525_s15 }
  0x43   : > { %p528_p0 = pneg %p527_p11 }
  0x44   : > { %p534_p2 = por %p533_p13, %p532_p6 }
  0x45   : > { %412 = vmatmul.mubr.msk.f32.vlgmr.msra.gmra.mrb[0].mxu0 %vm224_vm0, %v209_v15 }
  0x46   : > { %p535_p5 = pnand %p534_p2, %p528_p0 }
  0xbd   : > { %v222_v16 = vpop.permute.xlu0 %221 }
 0x118   : > { %v294_v17 = vpop.f32.mrb[0].mxu0 }
 0x119   : > { %v295_v18 = vadd.f32 %v294_v17, %v222_v16  ;;  %v296_v19 = vpop.f32.mrb[1].mxu0 }
 0x11a   : > { %v297_v20 = vadd.f32 %v296_v19, %v222_v16 }
 0x11b   : > { %299 = vst [vmem:[%s206_s23] sm:$0xff] %v295_v18 }
 0x11c   : > { %300 = vst [vmem:[%s206_s23 + $0x8] sm:$0xff] %v297_v20 }
 0x11d   : > { %538 = shalt.err (!%p535_p5)
}
 0x11e   : > { %s539_s11 = scalar_lea.hbm %s766_s4, 256  ;;  %s543_s6 = scalar_lea.hbm %s818_s3, 512 }
 0x11f   : > { %p540_p4 = scmp.ne.s32.totalorder %s766_s4, %s539_s11  ;;  %p544_p12 = scmp.lt.u32.totalorder %s766_s4, %s818_s3 }
 0x120   : > { %p545_p1 = scmp.lt.u32.totalorder %s543_s6, %s539_s11  ;;  %p547_p8 = scmp.lt.u32.totalorder %s539_s11, %s766_s4 }
 0x121   : > { %p541_p7 = pnand %p540_p4, %p826_p9 }
 0x122   : > { %p546_p3 = por %p545_p1, %p544_p12 }
 0x123   : > { %p542_p10 = pneg %p541_p7 }
 0x124   : > { %p548_p11 = por %p547_p8, %p546_p3 }
 0x126   : > { %p549_p0 = pnand %p548_p11, %p542_p10 }
 0x128   : > { %552 = shalt.err (!%p549_p0)
}
 0x129   : > { %430 = dma.vmem_to_hbm [thread:$0]  (%p826_p9), %s768_s28, 256, %s766_s4, %s302_s5  }
 0x12a PF: > { %s330_s10 = sand.u32 1, %s587_s12   ;;  %p827_p6 = scmp.ne.s32.totalorder %s823_s27, 0 }
 0x12b   : > { %p828_p13 = scmp.ge.s32.totalorder %s607_s17, 2  ;;  %s331_s22 = scalar_lea.sflag [#allocation4], %s330_s10 }
 0x12d   : > { %p437_p2 = pnand %p828_p13, %p827_p6 }
 0x12f   : > { %582 = dma.done.wait (!%p437_p2), %s331_s22, 256  }
 0x130   : > { %584 = vsyncadd (!%p437_p2), %s331_s22, 4294967040  ;;  %s19_s17 = sadd.s32 1, %s607_s17   ;;  %s829_s12 = smov %s591_s13 }
 0x131   : > { %p16_p5 = scmp.ge.s32.totalorder %s19_s17, 4   ;;  %s830_s13 = smov %s595_s14 }
 0x132   : > { %s831_s14 = smov %s691_s26  ;;  %s832_s15 = smov %s603_s16 }
 0x133   : > { %s833_s16 = smov %s835_s20  ;;  %18 = sbr.rel (!%p16_p5) target bundleno = 6 (0x6), region = 77 }
 0x13a   :  { %336 = vsyncpa [#allocation3], 1 }
 0x13b   :  { %338 = vsyncpa [#allocation3 + $0x1], 1 }
 0x13c   :  { %339 = vsyncpa [#allocation4], 1 }
 0x13d   :  { %341 = vsyncpa [#allocation4 + $0x1], 1 }

</bundles_post_ra>
